<compile_context>
chip_gen: v7x
topology: tpu7x:2x2x1
jax: 0.10.0
libtpu: 0.0.40
codegen_flags: <defaults>
</compile_context>

<pallas_src>
import functools
import math

import jax
import jax.numpy as jnp
from jax import lax
from jax.experimental import pallas as pl
from jax.experimental.pallas import tpu as pltpu

HIDDEN = 256
LN_EPS = 1e-5
_TM_MAX = 4096            # rows per grid step (review: 4096 on v6e/v7x; v5e ok
                          # too because we raise the scoped-VMEM limit below)
_SMALL_K_UNROLL = 8       # below this, Linear 1 runs on the VPU instead of MXU
_VMEM_LIMIT = 48 << 20    # > v5e's 16 MiB scoped default, < v7x 64 MiB physical


def state_encoder_kernel(x_ref, w1_ref, b1_ref, w2_ref, b2_ref, o_ref, *,
                         approximate_gelu, bf16_matmul):
    # NOTE: for a partial last tile (B % tm != 0) the padded rows hold stale
    # VMEM data and may become NaN/Inf through tanh/erf/rsqrt. That is fine:
    # every op below is row-wise and OOB rows are masked on store, so valid
    # rows are unaffected. (Not a bug if NaNs show up while debugging.)
    x = x_ref[...]                       # (TM, in_dim) f32
    w1 = w1_ref[...]                     # (in_dim, 256) f32
    in_dim = x.shape[1]

    # --- Linear 1: (TM, in_dim) @ (in_dim, 256) + (1, 256) ---
    if in_dim <= _SMALL_K_UNROLL:
        # K is tiny (maze2d in_dim = 4): unrolled broadcast FMAs on the VPU;
        # keeps the MXU free for Linear 2 and avoids a nearly-empty push/pop.
        h = b1_ref[...] + x[:, 0:1] * w1[0:1, :]
        for k in range(1, in_dim):
            h = h + x[:, k:k + 1] * w1[k:k + 1, :]
    else:
        h = jnp.dot(x, w1, preferred_element_type=jnp.float32) + b1_ref[...]

    # --- GELU ---
    if approximate_gelu:
        # tanh form: the transcendental runs on the (otherwise idle) EUP slot,
        # relieving the VALU slot that the erf polynomial was saturating.
        c = math.sqrt(2.0 / math.pi)
        h = 0.5 * h * (1.0 + jnp.tanh(c * (h + 0.044715 * (h * h * h))))
    else:
        # Exact erf GELU — matches torch.nn.GELU() (approximate='none').
        h = 0.5 * h * (1.0 + lax.erf(h * (1.0 / math.sqrt(2.0))))

    # --- LayerNorm statistics, one pass (eps=1e-5). The affine (gamma, beta)
    # was folded into w2/b2 by the wrapper, so only normalize here. ---
    mean = jnp.mean(h, axis=-1, keepdims=True)
    msq = jnp.mean(h * h, axis=-1, keepdims=True)
    inv = lax.rsqrt(msq - mean * mean + LN_EPS)
    hn = (h - mean) * inv

    # --- Linear 2: (TM, 256) @ (256, 256) + (1, 256) on the MXU ---
    if bf16_matmul:
        out = jnp.dot(hn.astype(jnp.bfloat16), w2_ref[...],
                      preferred_element_type=jnp.float32)
    else:
        out = jnp.dot(hn, w2_ref[...], preferred_element_type=jnp.float32)
    o_ref[...] = (out + b2_ref[...]).astype(o_ref.dtype)


def state_encoder(x, params, *, tm=None, approximate_gelu=True,
                  bf16_matmul=False, out_dtype=jnp.float32):
    """x: (B, in_dim) float32 -> (B, 256) out_dtype.

    approximate_gelu : tanh GELU (fast EUP path, default). False = exact erf,
        matching torch.nn.GELU()'s default numerics.
    bf16_matmul      : opt-in bf16 inputs for Linear 2 (full MXU rate on
        v5e/v6e), f32 accumulation; loosens tolerance to ~1e-2.
    out_dtype        : set jnp.bfloat16 to halve output write-back (v7x lever).
    """
    B, in_dim = x.shape
    w1, b1, gamma, beta, w2, b2 = params

    # Fold the LN affine into Linear 2 (zero runtime cost):
    #   (hn * gamma + beta) @ w2 + b2 == hn @ (gamma[:,None]*w2) + (beta@w2 + b2)
    w2_eff = gamma.reshape(HIDDEN, 1) * w2
    w2_eff = w2_eff.astype(jnp.bfloat16 if bf16_matmul else jnp.float32)
    b2_eff = (beta @ w2 + b2).astype(jnp.float32)

    if tm is None:
        if B <= 16:
            tm = B                       # tiny/latency case: one grid step
        else:
            # >= 2 grid steps so v7x's two TensorCores can shard the
            # "parallel" batch axis; capped by the per-step VMEM budget.
            half = ((-(-B // 2)) + 7) // 8 * 8
            tm = min(_TM_MAX, half)
    if tm != B and tm % 8 != 0:
        raise ValueError("tm must be a multiple of 8 (or equal to B)")

    grid = (pl.cdiv(B, tm),)

    def row_spec(shape):   # tiled over the batch grid axis (double-buffered DMA)
        return pl.BlockSpec(shape, lambda i: (i, 0))

    def pin_spec(shape):   # VMEM-resident across all grid steps (no re-DMA)
        return pl.BlockSpec(shape, lambda i: (0, 0))

    kernel = functools.partial(state_encoder_kernel,
                               approximate_gelu=approximate_gelu,
                               bf16_matmul=bf16_matmul)

    return pl.pallas_call(
        kernel,
        out_shape=jax.ShapeDtypeStruct((B, HIDDEN), out_dtype),
        grid=grid,
        in_specs=[
            row_spec((tm, in_dim)),       # x
            pin_spec((in_dim, HIDDEN)),   # w1
            pin_spec((1, HIDDEN)),        # b1
            pin_spec((HIDDEN, HIDDEN)),   # w2 (LN gamma folded in)
            pin_spec((1, HIDDEN)),        # b2 (LN beta folded in)
        ],
        out_specs=row_spec((tm, HIDDEN)),
        compiler_params=pltpu.CompilerParams(
            dimension_semantics=("parallel",),
            vmem_limit_bytes=_VMEM_LIMIT),
    )(x, w1, b1, w2_eff, b2_eff)


def init_params(key, in_dim):
    """Init mimicking torch.nn.Linear defaults; LN affine perturbed so the
    gamma/beta -> w2/b2 fold is actually exercised by the tests."""
    k1, k2, k3, k4, k5, k6 = jax.random.split(key, 6)
    bound1 = 1.0 / math.sqrt(in_dim)
    w1 = jax.random.uniform(k1, (in_dim, HIDDEN), jnp.float32, -bound1, bound1)
    b1 = jax.random.uniform(k2, (1, HIDDEN), jnp.float32, -bound1, bound1)
    gamma = 1.0 + 0.1 * jax.random.normal(k5, (1, HIDDEN), jnp.float32)
    beta = 0.1 * jax.random.normal(k6, (1, HIDDEN), jnp.float32)
    bound2 = 1.0 / math.sqrt(HIDDEN)
    w2 = jax.random.uniform(k3, (HIDDEN, HIDDEN), jnp.float32, -bound2, bound2)
    b2 = jax.random.uniform(k4, (1, HIDDEN), jnp.float32, -bound2, bound2)
    return (w1, b1, gamma, beta, w2, b2)


def _reference(x, params, *, approximate):
    """Plain-JAX StateEncoder forward (Linear -> GELU -> LayerNorm -> Linear)."""
    w1, b1, gamma, beta, w2, b2 = params
    h = x @ w1 + b1
    if approximate:
        c = math.sqrt(2.0 / math.pi)
        h = 0.5 * h * (1.0 + jnp.tanh(c * (h + 0.044715 * h ** 3)))
    else:
        h = 0.5 * h * (1.0 + lax.erf(h / math.sqrt(2.0)))
    mu = h.mean(-1, keepdims=True)
    var = ((h - mu) ** 2).mean(-1, keepdims=True)
    h = (h - mu) / jnp.sqrt(var + LN_EPS) * gamma + beta
    return h @ w2 + b2


if __name__ == "__main__":
    key = jax.random.PRNGKey(0)
    kx1, kx2, kx3, kp = jax.random.split(key, 4)

    in_dim = 4  # maze2d state dim = 4 (x, y, vx, vy)
    params = init_params(kp, in_dim)

    # Case 1: multi-step grid (B=48, tm=16 -> 3 steps), default tanh GELU.
    x1 = jax.random.normal(kx1, (48, in_dim), jnp.float32)
    o1 = jax.block_until_ready(state_encoder(x1, params, tm=16))
    r1 = _reference(x1, params, approximate=True)
    assert o1.shape == (48, HIDDEN)
    assert jnp.max(jnp.abs(o1 - r1)) < 5e-4

    # Case 2: partial last tile (B=20, tm=16 -> 2 steps, last block masked).
    x2 = jax.random.normal(kx2, (20, in_dim), jnp.float32)
    o2 = jax.block_until_ready(state_encoder(x2, params, tm=16))
    r2 = _reference(x2, params, approximate=True)
    assert o2.shape == (20, HIDDEN)
    assert bool(jnp.all(jnp.isfinite(o2)))
    assert jnp.max(jnp.abs(o2 - r2)) < 5e-4

    # Case 3: exact erf GELU path (torch.nn.GELU default numerics), one step.
    x3 = jax.random.normal(kx3, (8, in_dim), jnp.float32)
    o3 = jax.block_until_ready(state_encoder(x3, params, approximate_gelu=False))
    r3 = _reference(x3, params, approximate=False)
    assert jnp.max(jnp.abs(o3 - r3)) < 5e-4

    # Case 4: opt-in bf16 Linear-2 smoke test (looser tolerance by design).
    o4 = jax.block_until_ready(state_encoder(x1, params, tm=16, bf16_matmul=True))
    assert jnp.max(jnp.abs(o4 - r1)) < 5e-2

    # NOTE: in production, batch many states/timesteps per call so B reaches
    # the thousands (tm up to 4096 per step); at B~8-48 the call is launch-bound.
    print("KERNEL_OK")
</pallas_src>

<mosaic_0001>
module attributes {stable_mosaic.version = 11 : i64} {
  func.func @state_encoder_kernel(%arg0: i32, %arg1: memref<16x4xf32, #tpu.memory_space<vmem>>, %arg2: memref<4x256xf32, #tpu.memory_space<vmem>>, %arg3: memref<1x256xf32, #tpu.memory_space<vmem>>, %arg4: memref<256x256xf32, #tpu.memory_space<vmem>>, %arg5: memref<1x256xf32, #tpu.memory_space<vmem>>, %arg6: memref<16x256xf32, #tpu.memory_space<vmem>>) attributes {dimension_semantics = [#tpu.dimension_semantics<parallel>], iteration_bounds = array<i64: 3>, scalar_prefetch = 0 : i64, scratch_operands = 0 : i64, tpu.core_type = #tpu.core_type<tc>, window_params = [{transform_indices = @transform_0, window_bounds = array<i64: 16, 4>}, {pipeline_mode = #tpu.pipeline_mode<synchronous>, transform_indices = @transform_1, window_bounds = array<i64: 4, 256>}, {pipeline_mode = #tpu.pipeline_mode<synchronous>, transform_indices = @transform_2, window_bounds = array<i64: 1, 256>}, {pipeline_mode = #tpu.pipeline_mode<synchronous>, transform_indices = @transform_3, window_bounds = array<i64: 256, 256>}, {pipeline_mode = #tpu.pipeline_mode<synchronous>, transform_indices = @transform_4, window_bounds = array<i64: 1, 256>}, {transform_indices = @transform_5, window_bounds = array<i64: 16, 256>}]} {
    %c0 = arith.constant 0 : index
    %c0_0 = arith.constant 0 : index
    %0 = vector.load %arg1[%c0, %c0_0] : memref<16x4xf32, #tpu.memory_space<vmem>>, vector<16x4xf32>
    %c0_1 = arith.constant 0 : index
    %c0_2 = arith.constant 0 : index
    %1 = vector.load %arg2[%c0_1, %c0_2] : memref<4x256xf32, #tpu.memory_space<vmem>>, vector<4x256xf32>
    %c0_3 = arith.constant 0 : index
    %c0_4 = arith.constant 0 : index
    %2 = vector.load %arg3[%c0_3, %c0_4] : memref<1x256xf32, #tpu.memory_space<vmem>>, vector<1x256xf32>
    %3 = vector.extract_strided_slice %0 {offsets = [0, 0], sizes = [16, 1], strides = [1, 1]} : vector<16x4xf32> to vector<16x1xf32>
    %4 = vector.extract_strided_slice %1 {offsets = [0, 0], sizes = [1, 256], strides = [1, 1]} : vector<4x256xf32> to vector<1x256xf32>
    %5 = vector.broadcast %3 : vector<16x1xf32> to vector<16x256xf32>
    %6 = vector.broadcast %4 : vector<1x256xf32> to vector<16x256xf32>
    %7 = arith.mulf %5, %6 : vector<16x256xf32>
    %8 = vector.broadcast %2 : vector<1x256xf32> to vector<16x256xf32>
    %9 = arith.addf %8, %7 : vector<16x256xf32>
    %10 = vector.extract_strided_slice %0 {offsets = [0, 1], sizes = [16, 1], strides = [1, 1]} : vector<16x4xf32> to vector<16x1xf32>
    %11 = vector.extract_strided_slice %1 {offsets = [1, 0], sizes = [1, 256], strides = [1, 1]} : vector<4x256xf32> to vector<1x256xf32>
    %12 = vector.broadcast %10 : vector<16x1xf32> to vector<16x256xf32>
    %13 = vector.broadcast %11 : vector<1x256xf32> to vector<16x256xf32>
    %14 = arith.mulf %12, %13 : vector<16x256xf32>
    %15 = arith.addf %9, %14 : vector<16x256xf32>
    %16 = vector.extract_strided_slice %0 {offsets = [0, 2], sizes = [16, 1], strides = [1, 1]} : vector<16x4xf32> to vector<16x1xf32>
    %17 = vector.extract_strided_slice %1 {offsets = [2, 0], sizes = [1, 256], strides = [1, 1]} : vector<4x256xf32> to vector<1x256xf32>
    %18 = vector.broadcast %16 : vector<16x1xf32> to vector<16x256xf32>
    %19 = vector.broadcast %17 : vector<1x256xf32> to vector<16x256xf32>
    %20 = arith.mulf %18, %19 : vector<16x256xf32>
    %21 = arith.addf %15, %20 : vector<16x256xf32>
    %22 = vector.extract_strided_slice %0 {offsets = [0, 3], sizes = [16, 1], strides = [1, 1]} : vector<16x4xf32> to vector<16x1xf32>
    %23 = vector.extract_strided_slice %1 {offsets = [3, 0], sizes = [1, 256], strides = [1, 1]} : vector<4x256xf32> to vector<1x256xf32>
    %24 = vector.broadcast %22 : vector<16x1xf32> to vector<16x256xf32>
    %25 = vector.broadcast %23 : vector<1x256xf32> to vector<16x256xf32>
    %26 = arith.mulf %24, %25 : vector<16x256xf32>
    %27 = arith.addf %21, %26 : vector<16x256xf32>
    %cst = arith.constant 5.000000e-01 : f32
    %28 = vector.broadcast %cst : f32 to vector<16x256xf32>
    %29 = arith.mulf %28, %27 : vector<16x256xf32>
    %30 = arith.mulf %27, %27 : vector<16x256xf32>
    %31 = arith.mulf %30, %27 : vector<16x256xf32>
    %cst_5 = arith.constant 4.471500e-02 : f32
    %32 = vector.broadcast %cst_5 : f32 to vector<16x256xf32>
    %33 = arith.mulf %32, %31 : vector<16x256xf32>
    %34 = arith.addf %27, %33 : vector<16x256xf32>
    %cst_6 = arith.constant 0.797884583 : f32
    %35 = vector.broadcast %cst_6 : f32 to vector<16x256xf32>
    %36 = arith.mulf %35, %34 : vector<16x256xf32>
    %37 = math.tanh %36 : vector<16x256xf32>
    %cst_7 = arith.constant 1.000000e+00 : f32
    %38 = vector.broadcast %cst_7 : f32 to vector<16x256xf32>
    %39 = arith.addf %38, %37 : vector<16x256xf32>
    %40 = arith.mulf %29, %39 : vector<16x256xf32>
    %cst_8 = arith.constant dense<0.000000e+00> : vector<16xf32>
    %41 = vector.multi_reduction <add>, %40, %cst_8 [1] : vector<16x256xf32> to vector<16xf32>
    %42 = vector.shape_cast %41 : vector<16xf32> to vector<16x1xf32>
    %cst_9 = arith.constant 2.560000e+02 : f32
    %43 = vector.broadcast %cst_9 : f32 to vector<16x1xf32>
    %44 = arith.divf %42, %43 : vector<16x1xf32>
    %45 = arith.mulf %40, %40 : vector<16x256xf32>
    %cst_10 = arith.constant dense<0.000000e+00> : vector<16xf32>
    %46 = vector.multi_reduction <add>, %45, %cst_10 [1] : vector<16x256xf32> to vector<16xf32>
    %47 = vector.shape_cast %46 : vector<16xf32> to vector<16x1xf32>
    %cst_11 = arith.constant 2.560000e+02 : f32
    %48 = vector.broadcast %cst_11 : f32 to vector<16x1xf32>
    %49 = arith.divf %47, %48 : vector<16x1xf32>
    %50 = arith.mulf %44, %44 : vector<16x1xf32>
    %51 = arith.subf %49, %50 : vector<16x1xf32>
    %cst_12 = arith.constant 9.99999974E-6 : f32
    %52 = vector.broadcast %cst_12 : f32 to vector<16x1xf32>
    %53 = arith.addf %51, %52 : vector<16x1xf32>
    %54 = math.rsqrt %53 : vector<16x1xf32>
    %55 = vector.broadcast %44 : vector<16x1xf32> to vector<16x256xf32>
    %56 = arith.subf %40, %55 : vector<16x256xf32>
    %57 = vector.broadcast %54 : vector<16x1xf32> to vector<16x256xf32>
    %58 = arith.mulf %56, %57 : vector<16x256xf32>
    %c0_13 = arith.constant 0 : index
    %c0_14 = arith.constant 0 : index
    %59 = vector.load %arg4[%c0_13, %c0_14] : memref<256x256xf32, #tpu.memory_space<vmem>>, vector<256x256xf32>
    %cst_15 = arith.constant dense<0.000000e+00> : vector<16x256xf32>
    %60 = tpu.matmul %58, %59, %cst_15 {dimension_numbers = #tpu.dot_dimension_numbers<[1], [0], [0], [1], [0, 0, 1, 1], [], []>} : vector<16x256xf32>, vector<256x256xf32>, vector<16x256xf32> -> vector<16x256xf32>
    %c0_16 = arith.constant 0 : index
    %c0_17 = arith.constant 0 : index
    %61 = vector.load %arg5[%c0_16, %c0_17] : memref<1x256xf32, #tpu.memory_space<vmem>>, vector<1x256xf32>
    %62 = vector.broadcast %61 : vector<1x256xf32> to vector<16x256xf32>
    %63 = arith.addf %60, %62 : vector<16x256xf32>
    %c0_18 = arith.constant 0 : index
    %c0_19 = arith.constant 0 : index
    %64 = vector.load %arg6[%c0_18, %c0_19] : memref<16x256xf32, #tpu.memory_space<vmem>>, vector<16x256xf32>
    tpu.vector_store %arg6[%c0_18, %c0_19], %63 {strides = array<i32>} : memref<16x256xf32, #tpu.memory_space<vmem>>, vector<16x256xf32>,
    return
  }
  func.func @transform_0(%arg0: i32) -> (i32, i32) {
    %c0_i32 = arith.constant 0 : i32
    %c0_i32_0 = arith.constant 0 : i32
    return %arg0, %c0_i32 : i32, i32
  }
  func.func @transform_1(%arg0: i32) -> (i32, i32) {
    %c0_i32 = arith.constant 0 : i32
    %c0_i32_0 = arith.constant 0 : i32
    %c0_i32_1 = arith.constant 0 : i32
    return %c0_i32, %c0_i32_0 : i32, i32
  }
  func.func @transform_2(%arg0: i32) -> (i32, i32) {
    %c0_i32 = arith.constant 0 : i32
    %c0_i32_0 = arith.constant 0 : i32
    %c0_i32_1 = arith.constant 0 : i32
    return %c0_i32, %c0_i32_0 : i32, i32
  }
  func.func @transform_3(%arg0: i32) -> (i32, i32) {
    %c0_i32 = arith.constant 0 : i32
    %c0_i32_0 = arith.constant 0 : i32
    %c0_i32_1 = arith.constant 0 : i32
    return %c0_i32, %c0_i32_0 : i32, i32
  }
  func.func @transform_4(%arg0: i32) -> (i32, i32) {
    %c0_i32 = arith.constant 0 : i32
    %c0_i32_0 = arith.constant 0 : i32
    %c0_i32_1 = arith.constant 0 : i32
    return %c0_i32, %c0_i32_0 : i32, i32
  }
  func.func @transform_5(%arg0: i32) -> (i32, i32) {
    %c0_i32 = arith.constant 0 : i32
    %c0_i32_0 = arith.constant 0 : i32
    return %arg0, %c0_i32 : i32, i32
  }
}

</mosaic_0001>

<bundles_post_ra>
// kernel: tpu_custom_call.1
= control target key start
LH: loop header
LB: loop body
LE: loop exit
PB: predicated region body
PF: predicated region fallthrough
CT: control target
= control target key end

     0   :  { %10 = vsyncpa [#allocation3], 0  ;;  %s1223_s0 = inlined_call_operand.vmem [shape: f32[48,4], index: 0, kind: input, shape index: {}]   ;;  %s1224_s1 = inlined_call_operand.vmem [shape: f32[4,256], index: 1, kind: input, shape index: {}]   ;;  %s1225_s2 = inlined_call_operand.vmem [shape: f32[1,256], index: 2, kind: input, shape index: {}]   ;;  %s1226_s3 = inlined_call_operand.hbm [shape: f32[256,256], index: 3, kind: input, shape index: {}]   ;;  %s1227_s4 = inlined_call_operand.vmem [shape: f32[1,256], index: 4, kind: input, shape index: {}]   ;;  %s1228_s5 = inlined_call_operand.hbm [shape: f32[48,256], index: 5, kind: output, shape index: {}]  }
   0x1   :  { %11 = vsyncpa [#allocation4], 0 }
   0x2   :  { %13 = vsyncpa [#allocation4 + $0x1], 0  ;;  %s1039_s18 = smov 0   ;;  %s1041_s19 = smov 0  }
   0x3   :  { %s1043_s20 = smov 0   ;;  %s1045_s21 = smov 0  }
   0x4 LB: > { %s1060_s22 = sadd.s32 4294967295, %s997_s21   ;;  %s714_s23 = sadd.s32 4294967294, %s997_s21   ;;  %s997_s21 = sphi %s1045_s21, %s1244_s21   ;;  %s993_s20 = sphi %s1043_s20, %s1243_s20   ;;  %s989_s19 = sphi %s1041_s19, %s1242_s19   ;;  %s985_s18 = sphi %s1039_s18, %s1241_s18  }
   0x5   : > { %s1064_s24 = sadd.s32 1, %s997_s21   ;;  %s136_s25 = sadd.s32 1, %s993_s20 }
   0x6   : > { %s133_s26 = ssub.s32 %s997_s21, %s1064_s24  ;;  %p146_p0 = scmp.ne.s32.totalorder %s993_s20, %s989_s19 }
   0x7   : > { %p134_p1 = scmp.eq.s32.totalorder %s133_s26, 0  ;;  %p147_p2 = scmp.eq.s32.totalorder %s1060_s22, 2 }
   0x8   : > { %p152_p3 = scmp.ne.s32.totalorder %s989_s19, %s985_s18  ;;  %p153_p4 = scmp.eq.s32.totalorder %s714_s23, 2 }
   0x9   : > { %s1075_s27 = scalar_select %p134_p1, %s993_s20, %s136_s25  }
   0xa   : > { %p1077_p5 = por %p147_p2, %p146_p0  ;;  %p1081_p6 = por %p153_p4, %p152_p3 }
   0xb   : > { %p715_p7 = scmp.ge.s32.totalorder %s997_s21, 1  ;;  %p160_p8 = scmp.lt.s32.totalorder %s997_s21, 4 }
   0xc   : > { %s1232_s28 = scalar_select %p1077_p5, 1, 0 }
   0xd   : > { %s1233_s29 = scalar_select %p1081_p6, 1, 0 }
   0xe   : > { %p1229_p9 = scmp.eq.s32.totalorder %s1060_s22, 0  ;;  %p1088_p10 = pnand %p715_p7, %p160_p8 }
   0xf   : > { %s999_s6 = smov [#allocation2]   ;;  %s903_s11 = scalar_lea.hbm %s1226_s3, 8192 }
  0x10   : > { %s1234_s30 = scalar_select %p1088_p10, 1, 0 }
  0x11   : > { %s178_s7 = sshll.u32 %s999_s6, 4  ;;  %p833_p11 = pneg %p1088_p10  ;;  %s179_s7 = int_to_ptr.vmem [resolvable:$true] %s178_s7 }
  0x12   : > { %p904_p13 = scmp.ne.s32.totalorder %s1226_s3, %s903_s11  ;;  %p910_p3 = scmp.lt.u32.totalorder %s903_s11, %s1226_s3 }
  0x13   : > { %p1096_p12 = pnand %p1229_p9, %p833_p11 }
  0x15   : > { %p905_p0 = pneg %p1096_p12 }
  0x17   : > { %p906_p1 = pnand %p905_p0, %p904_p13 }
  0x19   : > { %p907_p2 = pneg %p906_p1 }
  0x1b   : > { %p912_p4 = pnand %p910_p3, %p907_p2 }
  0x1d   : > { %915 = shalt.err (!%p912_p4)
}
  0x1e   : > { %s916_s16 = scalar_lea.vmem %s179_s7, 8192  ;;  %p924_p9 = scmp.lt.s32.totalorder %s179_s7, %s179_s7 }
  0x1f   : > { %p917_p7 = scmp.ne.s32.totalorder %s179_s7, %s916_s16  ;;  %p925_p6 = scmp.lt.s32.totalorder %s916_s16, %s916_s16 }
  0x21   : > { %p919_p8 = pnand %p917_p7, %p905_p0  ;;  %p926_p5 = por %p925_p6, %p924_p9 }
  0x23   : > { %p920_p11 = pneg %p919_p8 }
  0x25   : > { %p927_p10 = pnand %p926_p5, %p920_p11 }
  0x27   : > { %930 = shalt.err (!%p927_p10)
}
  0x28   : > { %s1000_s17 = smov 256   ;;  %s1001_s23 = smov 16  }
  0x29   : > { %836 = dma.hbm_to_vmem [thread:$0]  (!%p1096_p12), %s1226_s3, 8192, %s179_s7, [#allocation3], %s1000_s17, %s1000_s17, %s1001_s23  }
  0x2a   : > { %p1236_p13 = scmp.ne.s32.totalorder %s1234_s30, 0 }
  0x2b   : > { %p1237_p1 = scmp.eq.s32.totalorder (!%p1236_p13), %s1060_s22, 0 }
  0x2c   : > { %206 = sbr.rel (%p1236_p13) target bundleno = 631 (0x277), region = 40 }
  0x33   : > { %976 = dma.done.wait (%p1237_p1), [#allocation3], 8192   ;;  %p1238_p0 = pmov %p1237_p1 }
  0x34   : > { %s721_s6 = sshll.u32 %s1060_s22, 1  ;;  %v1002_v0 = vmov 1   ;;  %v1003_v1 = vmov 0   ;;  %v1004_v4 = vmov 2   ;;  %v1005_v5 = vmov 3   ;;  %v469_v6 = vld [vmem:[#allocation2 + $0x8] sm:$0xff] }
  0x35   : > { %978 = vsyncadd (%p1238_p0), [#allocation3], 4294959104  ;;  %886 = vset.pattern.permute.xlu1 %v1002_v0  ;;  %885 = vset.pattern.permute.xlu0 %v1003_v1  ;;  %p235_p5 = scmp.lt.s32.totalorder %s721_s6, 5  ;;  %v471_v7 = vld [vmem:[#allocation2 + $0x18] sm:$0xff]  ;;  %v468_v8 = vld [vmem:[#allocation2] sm:$0xff]  ;;  %s231_s14 = sand.u32 1, %s989_s19  }
  0x36   : > { %v731_v9 = vpack.c.bf16 %v471_v7, %v469_v6  ;;  %v470_v10 = vld [vmem:[#allocation2 + $0x10] sm:$0xff]  ;;  %v473_v11 = vld [vmem:[#allocation2 + $0x28] sm:$0xff]  ;;  %v475_v12 = vld [vmem:[#allocation2 + $0x38] sm:$0xff]  ;;  %s720_s15 = sshll.u32 %s231_s14, 5  ;;  %s730_s26 = sshll.u32 %s1060_s22, 9 }
  0x37   : > { %s1246_s6 = smov (!%p235_p5, %s721_s6), 5  ;;  %v733_v13 = vpack.c.bf16 %v470_v10, %v468_v8  ;;  %v735_v14 = vpack.c.bf16 %v475_v12, %v473_v11  ;;  %v472_v15 = vld [vmem:[#allocation2 + $0x20] sm:$0xff]  ;;  %v474_v16 = vld [vmem:[#allocation2 + $0x30] sm:$0xff]  ;;  %v477_v17 = vld [vmem:[#allocation2 + $0x48] sm:$0xff]  ;;  %s233_s23 = scalar_lea.vmem [#allocation5], %s720_s15 }
  0x38   : > { %s722_s8 = sshll.u32 %s1246_s6, 3  ;;  %732 = vmatprep.subr.bf16.mxu0 %v731_v9  ;;  %795 = vmatprep.subr.bf16.mxu1 %v731_v9  ;;  %v479_v18 = vld [vmem:[#allocation2 + $0x58] sm:$0xff]  ;;  %v737_v19 = vpack.c.bf16 %v474_v16, %v472_v15  ;;  %v476_v21 = vld [vmem:[#allocation2 + $0x40] sm:$0xff]  ;;  %v478_v22 = vld [vmem:[#allocation2 + $0x50] sm:$0xff]  ;;  %s640_s25 = sshll.u32 %s233_s23, 4  ;;  %s1175_s25 = int_to_ptr.vmem [resolvable:$true] %s640_s25 }
  0x39   : > { %s238_s30 = scalar_lea.vmem %s1223_s0, %s722_s8  ;;  %734 = vmatpush1.bf16.msra.mxu0 %v733_v13  ;;  %811 = vmatpush1.bf16.msra.mxu1 %v733_v13  ;;  %v739_v20 = vpack.c.bf16 %v479_v18, %v477_v17  ;;  %v481_v23 = vld [vmem:[#allocation2 + $0x68] sm:$0xff]  ;;  %v483_v24 = vld [vmem:[#allocation2 + $0x78] sm:$0xff]  ;;  %v741_v25 = vpack.c.bf16 %v478_v22, %v476_v21  ;;  %v480_v27 = vld [vmem:[#allocation2 + $0x60] sm:$0xff]  ;;  %s1180_s9 = scalar_lea.hbm %s1228_s5, %s730_s26 }
  0x3a   : > { %v241_v2 = vld [vmem:[%s238_s30] sm:$0xff]  ;;  %v242_v3 = vld [vmem:[%s238_s30 + $0x8] sm:$0xff]  ;;  %736 = vmatprep.subr.bf16.mxu0 %v735_v14  ;;  %796 = vmatprep.subr.bf16.mxu1 %v735_v14  ;;  %v743_v26 = vpack.c.bf16 %v483_v24, %v481_v23  ;;  %v482_v28 = vld [vmem:[#allocation2 + $0x70] sm:$0xff]  ;;  %s1182_s22 = scalar_lea.sflag [#allocation4], %s231_s14  ;;  %s931_s7 = scalar_lea.vmem %s1175_s25, 512 }
  0x3b   : > { %294 = vperm.xlu1 %886, %v241_v2   ;;  %247 = vperm.xlu0 %885, %v241_v2   ;;  %v485_v29 = vld [vmem:[#allocation2 + $0x88] sm:$0xff]  ;;  %v487_v30 = vld [vmem:[#allocation2 + $0x98] sm:$0xff]  ;;  %v745_v31 = vpack.c.bf16 %v482_v28, %v480_v27  ;;  %v484_v33 = vld [vmem:[#allocation2 + $0x80] sm:$0xff]  ;;  %p932_p6 = scmp.ne.s32.totalorder %s1175_s25, %s931_s7  ;;  %p1239_p9 = scmp.ne.s32.totalorder %s1232_s28, 0 }
  0x3c   : > { %v747_v32 = vpack.c.bf16 %v487_v30, %v485_v29  ;;  %v486_v34 = vld [vmem:[#allocation2 + $0x90] sm:$0xff]  ;;  %v489_v35 = vld [vmem:[#allocation2 + $0xa8] sm:$0xff]  ;;  %v491_v36 = vld [vmem:[#allocation2 + $0xb8] sm:$0xff]  ;;  %s1006_s30 = smov [#allocation5]  }
  0x3d   : > { %738 = vmatpush1.bf16.msra.mxu0 %v737_v19  ;;  %812 = vmatpush1.bf16.msra.mxu1 %v737_v19  ;;  %v749_v37 = vpack.c.bf16 %v486_v34, %v484_v33  ;;  %v751_v38 = vpack.c.bf16 %v491_v36, %v489_v35  ;;  %v488_v39 = vld [vmem:[#allocation2 + $0xa0] sm:$0xff]  ;;  %v490_v40 = vld [vmem:[#allocation2 + $0xb0] sm:$0xff]  ;;  %v493_v41 = vld [vmem:[#allocation2 + $0xc8] sm:$0xff]  ;;  %p933_p10 = pnand %p932_p6, %p1239_p9  ;;  %s935_s10 = sshll.u32 %s1006_s30, 4  ;;  %s936_s10 = int_to_ptr.vmem [resolvable:$false] %s935_s10 }
  0x3e   : > { %740 = vmatprep.subr.bf16.mxu0 %v739_v20  ;;  %797 = vmatprep.subr.bf16.mxu1 %v739_v20  ;;  %v495_v42 = vld [vmem:[#allocation2 + $0xd8] sm:$0xff]  ;;  %v753_v43 = vpack.c.bf16 %v490_v40, %v488_v39  ;;  %v492_v45 = vld [vmem:[#allocation2 + $0xc0] sm:$0xff]  ;;  %v494_v46 = vld [vmem:[#allocation2 + $0xd0] sm:$0xff]  ;;  %s937_s11 = scalar_lea.vmem %s936_s10, 1024  ;;  %p938_p2 = scmp.lt.s32.totalorder %s1175_s25, %s936_s10 }
  0x3f   : > { %298 = vperm.xlu1 %886, %v242_v3   ;;  %252 = vperm.xlu0 %885, %v242_v3   ;;  %v755_v44 = vpack.c.bf16 %v495_v42, %v493_v41  ;;  %v497_v47 = vld [vmem:[#allocation2 + $0xe8] sm:$0xff]  ;;  %v499_v48 = vld [vmem:[#allocation2 + $0xf8] sm:$0xff]  ;;  %v757_v49 = vpack.c.bf16 %v494_v46, %v492_v45  ;;  %v496_v51 = vld [vmem:[#allocation2 + $0xe0] sm:$0xff]  ;;  %p934_p12 = pneg %p933_p10  ;;  %p939_p3 = scmp.lt.s32.totalorder %s937_s11, %s931_s7 }
  0x40   : > { %v759_v50 = vpack.c.bf16 %v499_v48, %v497_v47  ;;  %v498_v52 = vld [vmem:[#allocation2 + $0xf0] sm:$0xff]  ;;  %v501_v53 = vld [vmem:[#allocation2 + $0x108] sm:$0xff]  ;;  %v503_v54 = vld [vmem:[#allocation2 + $0x118] sm:$0xff] }
  0x41   : > { %742 = vmatpush1.bf16.msra.mxu0 %v741_v25  ;;  %813 = vmatpush1.bf16.msra.mxu1 %v741_v25  ;;  %v761_v55 = vpack.c.bf16 %v498_v52, %v496_v51  ;;  %v763_v56 = vpack.c.bf16 %v503_v54, %v501_v53  ;;  %v500_v57 = vld [vmem:[#allocation2 + $0x100] sm:$0xff]  ;;  %v502_v58 = vld [vmem:[#allocation2 + $0x110] sm:$0xff]  ;;  %v505_v59 = vld [vmem:[#allocation2 + $0x128] sm:$0xff]  ;;  %p940_p4 = por %p939_p3, %p938_p2 }
  0x42   : > { %744 = vmatprep.subr.bf16.mxu0 %v743_v26  ;;  %798 = vmatprep.subr.bf16.mxu1 %v743_v26  ;;  %v507_v60 = vld [vmem:[#allocation2 + $0x138] sm:$0xff]  ;;  %v765_v61 = vpack.c.bf16 %v502_v58, %v500_v57  ;;  %v504_v63 = vld [vmem:[#allocation2 + $0x120] sm:$0xff]  ;;  %v506_v0 = vld [vmem:[#allocation2 + $0x130] sm:$0xff] }
  0x43   : > { %888 = vset.pattern.permute.xlu1 %v1004_v4  ;;  %887 = vset.pattern.permute.xlu0 %v1004_v4  ;;  %v767_v62 = vpack.c.bf16 %v507_v60, %v505_v59  ;;  %v769_v1 = vpack.c.bf16 %v506_v0, %v504_v63  ;;  %v243_v6 = vld [vmem:[%s1224_s1] sm:$0xff]  ;;  %p941_p7 = pnand %p940_p4, %p934_p12 }
  0x44   : > { %332 = vperm.xlu1 %888, %v242_v3   ;;  %328 = vperm.xlu0 %887, %v241_v2   ;;  %v244_v19 = vld [vmem:[%s1225_s2] sm:$0x3] }
  0x45   : > { %746 = vmatpush1.bf16.msra.mxu0 %v745_v31  ;;  %814 = vmatpush1.bf16.msra.mxu1 %v745_v31 }
  0x46   : > { %748 = vmatprep.subr.bf16.mxu0 %v747_v32  ;;  %799 = vmatprep.subr.bf16.mxu1 %v747_v32 }
  0x48   : > { %889 = vset.pattern.permute.xlu1 %v1005_v5  ;;  %890 = vset.pattern.permute.xlu0 %v1005_v5 }
  0x49   : > { %362 = vperm.xlu1 %889, %v241_v2   ;;  %366 = vperm.xlu0 %890, %v242_v3   ;;  %v256_v2 = vlaneseq }
  0x4a   : > { %750 = vmatpush1.bf16.msra.mxu0 %v749_v37  ;;  %815 = vmatpush1.bf16.msra.mxu1 %v749_v37 }
  0x4b   : > { %752 = vmatprep.subr.bf16.mxu0 %v751_v38  ;;  %800 = vmatprep.subr.bf16.mxu1 %v751_v38  ;;  %v257_v3 = vshrl.u32 %v256_v2, 7 }
  0x4d   : > { %v1126_v4 = vsub.s32 0, %v257_v3  ;;  %v262_v5 = vsub.s32 4, %v257_v3  ;;  %v1132_v9 = vsub.s32 1, %v257_v3  ;;  %v307_v10 = vsub.s32 5, %v257_v3 }
  0x4e   : > { %754 = vmatpush1.bf16.msra.mxu0 %v753_v43  ;;  %816 = vmatpush1.bf16.msra.mxu1 %v753_v43  ;;  %v337_v11 = vsub.s32 2, %v257_v3  ;;  %v341_v12 = vsub.s32 6, %v257_v3  ;;  %v371_v22 = vsub.s32 3, %v257_v3  ;;  %v375_v23 = vsub.s32 7, %v257_v3 }
  0x4f   : > { %756 = vmatprep.subr.bf16.mxu0 %v755_v44  ;;  %801 = vmatprep.subr.bf16.mxu1 %v755_v44  ;;  %v259_v7 = vrot.slane %v243_v6, %v1126_v4  ;;  %v263_v8 = vrot.slane %v243_v6, %v262_v5  ;;  %v304_v17 = vrot.slane %v243_v6, %v1132_v9 }
  0x50   : > { %v308_v18 = vrot.slane %v243_v6, %v307_v10  ;;  %v338_v20 = vrot.slane %v243_v6, %v337_v11  ;;  %v342_v21 = vrot.slane %v243_v6, %v341_v12  ;;  %v282_v24 = vrot.slane %v244_v19, %v1126_v4 }
  0x51   : > { %v269_v14 = vrot.slane %v259_v7, %v1126_v4  ;;  %v273_v15 = vrot.slane %v263_v8, %v1126_v4  ;;  %v286_v25 = vrot.slane %v244_v19, %v1132_v9  ;;  %v314_v30 = vrot.slane %v304_v17, %v1132_v9 }
  0x52   : > { %758 = vmatpush1.bf16.msra.mxu0 %v757_v49  ;;  %817 = vmatpush1.bf16.msra.mxu1 %v757_v49  ;;  %v318_v31 = vrot.slane %v308_v18, %v1132_v9  ;;  %v348_v34 = vrot.slane %v338_v20, %v337_v11  ;;  %v352_v35 = vrot.slane %v342_v21, %v337_v11 }
  0x53   : > { %760 = vmatprep.subr.bf16.mxu0 %v759_v50  ;;  %802 = vmatprep.subr.bf16.mxu1 %v759_v50  ;;  %v372_v36 = vrot.slane %v243_v6, %v371_v22  ;;  %v376_v37 = vrot.slane %v243_v6, %v375_v23 }
  0x55   : > { %v382_v54 = vrot.slane %v372_v36, %v371_v22 }
  0x56   : > { %762 = vmatpush1.bf16.msra.mxu0 %v761_v55  ;;  %818 = vmatpush1.bf16.msra.mxu1 %v761_v55  ;;  %v386_v55 = vrot.slane %v376_v37, %v371_v22 }
  0x57   : > { %764 = vmatprep.subr.bf16.mxu0 %v763_v56  ;;  %803 = vmatprep.subr.bf16.mxu1 %v763_v56 }
  0x5a   : > { %766 = vmatpush1.bf16.msra.mxu0 %v765_v61  ;;  %819 = vmatpush1.bf16.msra.mxu1 %v765_v61 }
  0x5b   : > { %768 = vmatprep.subr.bf16.mxu0 %v767_v62  ;;  %804 = vmatprep.subr.bf16.mxu1 %v767_v62 }
  0x5e   : > { %770 = vmatpush1.bf16.msra.mxu0 %v769_v1  ;;  %820 = vmatpush1.bf16.msra.mxu1 %v769_v1 }
  0xba   : > { %v295_v13 = vpop.permute.xlu1 %294  ;;  %v248_v16 = vpop.permute.xlu0 %247 }
  0xbb   : > { %v274_v26 = vmul.f32 %v269_v14, %v248_v16  ;;  %v275_v27 = vmul.f32 %v273_v15, %v248_v16  ;;  %v319_v44 = vmul.f32 %v314_v30, %v295_v13  ;;  %v320_v45 = vmul.f32 %v318_v31, %v295_v13 }
  0xbd   : > { %v289_v42 = vadd.f32 %v282_v24, %v274_v26  ;;  %v290_v43 = vadd.f32 %v286_v25, %v275_v27 }
  0xbe   : > { %v299_v28 = vpop.permute.xlu1 %298  ;;  %v253_v29 = vpop.permute.xlu0 %252 }
  0xbf   : > { %v276_v32 = vmul.f32 %v269_v14, %v253_v29  ;;  %v277_v33 = vmul.f32 %v273_v15, %v253_v29  ;;  %v321_v38 = vmul.f32 %v314_v30, %v299_v28  ;;  %v322_v39 = vmul.f32 %v318_v31, %v299_v28 }
  0xc0   : > { %v323_v56 = vadd.f32 %v319_v44, %v289_v42  ;;  %v324_v57 = vadd.f32 %v320_v45, %v290_v43 }
  0xc1   : > { %v291_v40 = vadd.f32 %v282_v24, %v276_v32  ;;  %v292_v41 = vadd.f32 %v286_v25, %v277_v33 }
  0xc3   : > { %v333_v46 = vpop.permute.xlu1 %332  ;;  %v325_v47 = vadd.f32 %v321_v38, %v291_v40  ;;  %v326_v48 = vadd.f32 %v322_v39, %v292_v41  ;;  %v329_v49 = vpop.permute.xlu0 %328 }
  0xc4   : > { %v355_v50 = vmul.f32 %v348_v34, %v333_v46  ;;  %v356_v51 = vmul.f32 %v352_v35, %v333_v46  ;;  %v353_v52 = vmul.f32 %v348_v34, %v329_v49  ;;  %v354_v53 = vmul.f32 %v352_v35, %v329_v49 }
  0xc6   : > { %v359_v58 = vadd.f32 %v355_v50, %v325_v47  ;;  %v360_v59 = vadd.f32 %v356_v51, %v326_v48  ;;  %v357_v60 = vadd.f32 %v353_v52, %v323_v56  ;;  %v358_v61 = vadd.f32 %v354_v53, %v324_v57  ;;  %v508_v57 = vld [vmem:[#allocation2 + $0x140] sm:$0xff] }
  0xc8   : > { %v363_v62 = vpop.permute.xlu1 %362  ;;  %v367_v63 = vpop.permute.xlu0 %366 }
  0xc9   : > { %v387_v0 = vmul.f32 %v382_v54, %v363_v62  ;;  %v388_v1 = vmul.f32 %v386_v55, %v363_v62  ;;  %v389_v2 = vmul.f32 %v382_v54, %v367_v63  ;;  %v390_v3 = vmul.f32 %v386_v55, %v367_v63  ;;  %v509_v54 = vld [vmem:[#allocation2 + $0x148] sm:$0xff]  ;;  %v511_v55 = vld [vmem:[#allocation2 + $0x158] sm:$0xff]  ;;  %v512_v63 = vld [vmem:[#allocation2 + $0x160] sm:$0xff] }
  0xca   : > { %v771_v56 = vpack.c.bf16 %v511_v55, %v509_v54 }
  0xcb   : > { %v391_v5 = vadd.f32 %v387_v0, %v357_v60  ;;  %v392_v6 = vadd.f32 %v388_v1, %v358_v61  ;;  %v393_v7 = vadd.f32 %v389_v2, %v359_v58  ;;  %v394_v8 = vadd.f32 %v390_v3, %v360_v59  ;;  %v510_v58 = vld [vmem:[#allocation2 + $0x150] sm:$0xff]  ;;  %v513_v60 = vld [vmem:[#allocation2 + $0x168] sm:$0xff]  ;;  %v515_v61 = vld [vmem:[#allocation2 + $0x178] sm:$0xff] }
  0xcc   : > { %v773_v59 = vpack.c.bf16 %v510_v58, %v508_v57  ;;  %772 = vmatprep.subr.bf16.mxu0 %v771_v56  ;;  %805 = vmatprep.subr.bf16.mxu1 %v771_v56  ;;  %v775_v62 = vpack.c.bf16 %v515_v61, %v513_v60  ;;  %v514_v0 = vld [vmem:[#allocation2 + $0x170] sm:$0xff]  ;;  %v517_v2 = vld [vmem:[#allocation2 + $0x188] sm:$0xff]  ;;  %v519_v3 = vld [vmem:[#allocation2 + $0x198] sm:$0xff] }
  0xcd   : > { %v399_v10 = vmul.f32 %v391_v5, %v391_v5  ;;  %v400_v11 = vmul.f32 %v392_v6, %v392_v6  ;;  %v401_v12 = vmul.f32 %v393_v7, %v393_v7  ;;  %v402_v13 = vmul.f32 %v394_v8, %v394_v8 }
  0xce   : > { %v395_v32 = vmul.f32 0.5, %v391_v5  ;;  %v396_v35 = vmul.f32 0.5, %v392_v6  ;;  %v397_v39 = vmul.f32 0.5, %v393_v7  ;;  %v398_v42 = vmul.f32 0.5, %v394_v8  ;;  %774 = vmatpush1.bf16.msra.mxu0 %v773_v59  ;;  %821 = vmatpush1.bf16.msra.mxu1 %v773_v59 }
  0xcf   : > { %v403_v14 = vmul.f32 %v399_v10, %v391_v5  ;;  %v404_v15 = vmul.f32 %v400_v11, %v392_v6  ;;  %v405_v16 = vmul.f32 %v401_v12, %v393_v7  ;;  %v406_v17 = vmul.f32 %v402_v13, %v394_v8  ;;  %776 = vmatprep.subr.bf16.mxu0 %v775_v62  ;;  %v521_v10 = vld [vmem:[#allocation2 + $0x1a8] sm:$0xff]  ;;  %v523_v11 = vld [vmem:[#allocation2 + $0x1b8] sm:$0xff]  ;;  %v520_v13 = vld [vmem:[#allocation2 + $0x1a0] sm:$0xff] }
  0xd0   : > { %v777_v1 = vpack.c.bf16 %v514_v0, %v512_v63  ;;  %806 = vmatprep.subr.bf16.mxu1 %v775_v62  ;;  %v783_v12 = vpack.c.bf16 %v523_v11, %v521_v10 }
  0xd1   : > { %v407_v18 = vmul.f32 0.044715, %v403_v14  ;;  %v408_v19 = vmul.f32 0.044715, %v404_v15  ;;  %v409_v20 = vmul.f32 0.044715, %v405_v16 }
  0xd2   : > { %v410_v21 = vmul.f32 0.044715, %v406_v17  ;;  %778 = vmatpush1.bf16.msra.mxu0 %v777_v1  ;;  %822 = vmatpush1.bf16.msra.mxu1 %v777_v1  ;;  %v522_v14 = vld [vmem:[#allocation2 + $0x1b0] sm:$0xff]  ;;  %v525_v15 = vld [vmem:[#allocation2 + $0x1c8] sm:$0xff]  ;;  %v527_v17 = vld [vmem:[#allocation2 + $0x1d8] sm:$0xff] }
  0xd3   : > { %v411_v22 = vadd.f32 %v407_v18, %v391_v5  ;;  %v412_v23 = vadd.f32 %v408_v19, %v392_v6  ;;  %v413_v24 = vadd.f32 %v409_v20, %v393_v7  ;;  %v779_v5 = vpack.c.bf16 %v519_v3, %v517_v2  ;;  %v516_v6 = vld [vmem:[#allocation2 + $0x180] sm:$0xff]  ;;  %v518_v7 = vld [vmem:[#allocation2 + $0x190] sm:$0xff] }
  0xd4   : > { %v414_v25 = vadd.f32 %v410_v21, %v394_v8  ;;  %v781_v8 = vpack.c.bf16 %v518_v7, %v516_v6  ;;  %v785_v16 = vpack.c.bf16 %v522_v14, %v520_v13  ;;  %v524_v18 = vld [vmem:[#allocation2 + $0x1c0] sm:$0xff]  ;;  %v526_v19 = vld [vmem:[#allocation2 + $0x1d0] sm:$0xff]  ;;  %v787_v20 = vpack.c.bf16 %v527_v17, %v525_v15  ;;  %v529_v21 = vld [vmem:[#allocation2 + $0x1e8] sm:$0xff] }
  0xd5   : > { %v415_v26 = vmul.f32 0.7978846, %v411_v22  ;;  %v416_v27 = vmul.f32 0.7978846, %v412_v23  ;;  %v417_v28 = vmul.f32 0.7978846, %v413_v24  ;;  %780 = vmatprep.subr.bf16.mxu0 %v779_v5  ;;  %807 = vmatprep.subr.bf16.mxu1 %v779_v5  ;;  %v789_v23 = vpack.c.bf16 %v526_v19, %v524_v18 }
  0xd6   : > { %v418_v29 = vmul.f32 0.7978846, %v414_v25  ;;  %782 = vmatpush1.bf16.msra.mxu0 %v781_v8  ;;  %823 = vmatpush1.bf16.msra.mxu1 %v781_v8  ;;  %v531_v22 = vld [vmem:[#allocation2 + $0x1f8] sm:$0xff]  ;;  %v528_v25 = vld [vmem:[#allocation2 + $0x1e0] sm:$0xff] }
  0xd7   : > { %891 = vtanh.f32 %v415_v26  ;;  %784 = vmatprep.subr.bf16.mxu0 %v783_v12  ;;  %808 = vmatprep.subr.bf16.mxu1 %v783_v12  ;;  %v791_v24 = vpack.c.bf16 %v531_v22, %v529_v21  ;;  %v530_v26 = vld [vmem:[#allocation2 + $0x1f0] sm:$0xff] }
  0xd8   : > { %893 = vtanh.f32 %v416_v27  ;;  %v793_v27 = vpack.c.bf16 %v530_v26, %v528_v25 }
  0xd9   : > { %895 = vtanh.f32 %v417_v28 }
  0xda   : > { %897 = vtanh.f32 %v418_v29  ;;  %786 = vmatpush1.bf16.msra.mxu0 %v785_v16  ;;  %824 = vmatpush1.bf16.msra.mxu1 %v785_v16 }
  0xdb   : > { %788 = vmatprep.subr.bf16.mxu0 %v787_v20  ;;  %809 = vmatprep.subr.bf16.mxu1 %v787_v20 }
  0xde   : > { %790 = vmatpush1.bf16.msra.mxu0 %v789_v23  ;;  %825 = vmatpush1.bf16.msra.mxu1 %v789_v23 }
  0xdf   : > { %792 = vmatprep.subr.bf16.mxu0 %v791_v24  ;;  %810 = vmatprep.subr.bf16.mxu1 %v791_v24 }
  0xe1   : > { %v892_v30 = vpop.eup %891 }
  0xe2   : > { %v894_v31 = vpop.eup %893  ;;  %v423_v33 = vadd.f32 1.0, %v892_v30  ;;  %794 = vmatpush1.bf16.msra.mxu0 %v793_v27  ;;  %826 = vmatpush1.bf16.msra.mxu1 %v793_v27 }
  0xe3   : > { %v896_v34 = vpop.eup %895  ;;  %v424_v36 = vadd.f32 1.0, %v894_v31 }
  0xe4   : > { %v898_v37 = vpop.eup %897  ;;  %v1144_v38 = vmul.f32 %v423_v33, %v395_v32  ;;  %v425_v40 = vadd.f32 1.0, %v896_v34 }
  0xe5   : > { %v1146_v41 = vmul.f32 %v424_v36, %v396_v35  ;;  %v426_v43 = vadd.f32 1.0, %v898_v37 }
  0xe6   : > { %v1148_v44 = vmul.f32 %v425_v40, %v397_v39  ;;  %v440_v47 = vmul.f32 %v1144_v38, %v1144_v38 }
  0xe7   : > { %v431_v45 = vadd.f32 %v1146_v41, %v1144_v38  ;;  %v1152_v46 = vmul.f32 %v426_v43, %v398_v42  ;;  %v441_v48 = vmul.f32 %v1146_v41, %v1146_v41 }
  0xe8   : > { %v442_v50 = vmul.f32 %v1148_v44, %v1148_v44 }
  0xe9   : > { %432 = vadd.xlane.f32.xlu1 %v431_v45  ;;  %v434_v49 = vadd.f32 %v1152_v46, %v1148_v44  ;;  %v443_v51 = vmul.f32 %v1152_v46, %v1152_v46  ;;  %v444_v52 = vadd.f32 %v441_v48, %v440_v47 }
  0xeb   : > { %435 = vadd.xlane.f32.xlu0 %v434_v49  ;;  %v447_v53 = vadd.f32 %v443_v51, %v442_v50 }
  0xed   : > { %445 = vadd.xlane.f32.xlu1 %v444_v52 }
  0xef   : > { %448 = vadd.xlane.f32.xlu0 %v447_v53 }
 0x176   : > { %v433_v28 = vpop.xlane.xlu1 %432 }
 0x177   : > { %v438_v29 = vmul.f32 0.00390625, %v433_v28 }
 0x178   : > { %v436_v30 = vpop.xlane.xlu0 %435 }
 0x179   : > { %v439_v31 = vmul.f32 0.00390625, %v436_v30  ;;  %v452_v33 = vmul.f32 %v438_v29, %v438_v29  ;;  %v460_v45 = vsub.f32 %v1144_v38, %v438_v29  ;;  %v461_v47 = vsub.f32 %v1146_v41, %v438_v29  ;;  %v532_v38 = vld [vmem:[%s1227_s4] sm:$0x3] }
 0x17a   : > { %v446_v32 = vpop.xlane.xlu1 %445  ;;  %v537_v41 = vrot.slane %v532_v38, %v1126_v4 }
 0x17b   : > { %v450_v34 = vmul.f32 0.00390625, %v446_v32  ;;  %v453_v37 = vmul.f32 %v439_v31, %v439_v31  ;;  %v462_v49 = vsub.f32 %v1148_v44, %v439_v31  ;;  %v463_v51 = vsub.f32 %v1152_v46, %v439_v31 }
 0x17c   : > { %v449_v35 = vpop.xlane.xlu0 %448  ;;  %v541_v44 = vrot.slane %v532_v38, %v1132_v9 }
 0x17d   : > { %v454_v36 = vsub.f32 %v450_v34, %v452_v33  ;;  %v451_v39 = vmul.f32 0.00390625, %v449_v35 }
 0x17f   : > { %v456_v40 = vadd.f32 1e-05, %v454_v36  ;;  %v455_v42 = vsub.f32 %v451_v39, %v453_v37 }
 0x181   : > { %899 = vrsqrt.f32 %v456_v40  ;;  %v457_v43 = vadd.f32 1e-05, %v455_v42 }
 0x183   : > { %901 = vrsqrt.f32 %v457_v43 }
 0x18b   : > { %v900_v48 = vpop.eup %899 }
 0x18c   : > { %v465_v50 = vmul.f32 %v900_v48, %v461_v47  ;;  %v464_v52 = vmul.f32 %v900_v48, %v460_v45 }
 0x18d   : > { %v902_v53 = vpop.eup %901 }
 0x18e   : > { %608 = vmatprep.mubr.f32.mxu0 %v465_v50  ;;  %v467_v54 = vmul.f32 %v902_v53, %v463_v51  ;;  %v466_v55 = vmul.f32 %v902_v53, %v462_v49 }
 0x18f   : > { %609 = vmatmul.mubr.f32.vlgmr.msra.gmra.mrb[0].mxu0 %v464_v52 }
 0x190   : > { %614 = vmatprep.mubr.f32.mxu1 %v467_v54 }
 0x191   : > { %615 = vmatmul.mubr.f32.vlgmr.msra.gmra.mrb[0].mxu1 %v466_v55 }
 0x262   : > { %v610_v46 = vpop.f32.mrb[0].mxu0 }
 0x263   : > { %v611_v56 = vadd.f32 %v610_v46, %v537_v41  ;;  %v612_v57 = vpop.f32.mrb[1].mxu0 }
 0x264   : > { %v616_v58 = vpop.f32.mrb[0].mxu1  ;;  %v613_v59 = vadd.f32 %v612_v57, %v541_v44 }
 0x265   : > { %621 = vst [vmem:[%s233_s23] sm:$0xff] %v611_v56  ;;  %v617_v60 = vadd.f32 %v616_v58, %v537_v41  ;;  %v618_v61 = vpop.f32.mrb[1].mxu1 }
 0x266   : > { %622 = vst [vmem:[%s233_s23 + $0x8] sm:$0xff] %v613_v59  ;;  %v619_v4 = vadd.f32 %v618_v61, %v541_v44 }
 0x267   : > { %623 = vst [vmem:[%s233_s23 + $0x10] sm:$0xff] %v617_v60 }
 0x268   : > { %624 = vst [vmem:[%s233_s23 + $0x18] sm:$0xff] %v619_v4 }
 0x269   : > { %944 = shalt.err (!%p941_p7)
}
 0x26a   : > { %s945_s12 = scalar_lea.hbm %s1180_s9, 512  ;;  %s949_s15 = scalar_lea.hbm %s1228_s5, 1536 }
 0x26b   : > { %p946_p8 = scmp.ne.s32.totalorder %s1180_s9, %s945_s12  ;;  %p950_p1 = scmp.lt.u32.totalorder %s1180_s9, %s1228_s5 }
 0x26c   : > { %p951_p0 = scmp.lt.u32.totalorder %s949_s15, %s945_s12  ;;  %p953_p6 = scmp.lt.u32.totalorder %s945_s12, %s1180_s9 }
 0x26d   : > { %p947_p11 = pnand %p946_p8, %p1239_p9 }
 0x26e   : > { %p952_p5 = por %p951_p0, %p950_p1 }
 0x26f   : > { %p948_p13 = pneg %p947_p11 }
 0x270   : > { %p954_p10 = por %p953_p6, %p952_p5 }
 0x272   : > { %p955_p12 = pnand %p954_p10, %p948_p13 }
 0x274   : > { %958 = shalt.err (!%p955_p12)
}
 0x275   : > { %s1007_s23 = smov 256   ;;  %s1008_s26 = smov 16  }
 0x276   : > { %831 = dma.vmem_to_hbm [thread:$0]  (%p1239_p9), %s1175_s25, 512, %s1180_s9, %s1182_s22, %s1007_s23, %s1007_s23, %s1008_s26  }
 0x277 PF: > { %p843_p2 = scmp.ge.s32.totalorder %s997_s21, 2  ;;  %s655_s6 = sand.u32 1, %s985_s18  }
 0x278   : > { %p1240_p3 = scmp.ne.s32.totalorder %s1233_s29, 0  ;;  %s656_s8 = scalar_lea.sflag [#allocation4], %s655_s6 }
 0x27a   : > { %p838_p4 = pnand %p843_p2, %p1240_p3 }
 0x27c   : > { %980 = dma.done.wait (!%p838_p4), %s656_s8, 512  }
 0x27d   : > { %982 = vsyncadd (!%p838_p4), %s656_s8, 4294966784  ;;  %p16_p7 = scmp.ge.s32.totalorder %s1064_s24, 5   ;;  %s1241_s18 = smov %s989_s19 }
 0x27e   : > { %s1242_s19 = smov %s993_s20  ;;  %s1243_s20 = smov %s1075_s27 }
 0x27f   : > { %s1244_s21 = smov %s1064_s24  ;;  %18 = sbr.rel (!%p16_p7) target bundleno = 4 (0x4), region = 80 }
 0x286   :  { %661 = vsyncpa [#allocation3], 1 }
 0x287   :  { %663 = vsyncpa [#allocation3 + $0x1], 1 }
 0x288   :  { %664 = vsyncpa [#allocation4], 1 }
 0x289   :  { %666 = vsyncpa [#allocation4 + $0x1], 1 }

</bundles_post_ra>
